<compile_context>
chip_gen: v6e
topology: v6e:2x2x1
jax: 0.10.0
libtpu: 0.0.40
codegen_flags: <defaults>
</compile_context>

<pallas_src>
import functools
import math

import jax
import jax.numpy as jnp
from jax import lax
from jax.experimental import pallas as pl
from jax.experimental.pallas import tpu as pltpu

D_MODEL = 32        # d_model (must be even, as the PyTorch module implicitly requires)
MAX_LEN = 5000      # PyTorch max_len default (upper bound on usable sequence length)

_LANES = 128
_INV_TWO_PI = 1.0 / (2.0 * math.pi)
_TWO_PI_HI = 6.28125                       # 8 significand bits -> k * HI exact for k < 2^16
_TWO_PI_LO = 2.0 * math.pi - _TWO_PI_HI    # ~1.9353e-3

# sin(r) ~= r * (c0 + c1 r^2 + ... + c6 r^12): degree-13 odd polynomial for |r| <= pi,
# max abs error ~2.2e-5 (well inside the 1e-4 comparison tolerance).
_SIN_COEFFS = (
    1.0,
    -1.0 / 6.0,
    1.0 / 120.0,
    -1.0 / 5040.0,
    1.0 / 362880.0,
    -1.0 / 39916800.0,
    1.0 / 6227020800.0,
)


def _round_up(n, m):
    return ((n + m - 1) // m) * m


def _pe_kernel(consts_ref, out_ref, *, fold):
    """Writes a (TR, 128) lane-dense block: row r, lane l -> position fold*r + l//D, col l%D."""
    tr = out_ref.shape[0]
    c = consts_ref[...]                       # (8, 128); rows 0..3 carry per-lane constants
    omega = c[0:1, :]                         # div_term[(lane % D) // 2]
    off = c[1:2, :]                           # position offset within the fold (0..fold-1)
    phase = c[2:3, :]                         # 0 (even col -> sin) or pi/2 (odd col -> cos)
    kbias = c[3:4, :]                         # phase / (2*pi) + 0.5  (exactly 0.5 / 0.75)

    # Global position of each (row, lane): integers < 2^24, exact in f32.
    row = lax.broadcasted_iota(jnp.int32, (tr, _LANES), 0)
    base = pl.program_id(0) * (tr * fold)
    pos = (row * fold + base).astype(jnp.float32) + off

    # Argument x = position * div_term -> identical f32 rounding to the reference table.
    x = pos * omega

    # cos(x) = sin(x + pi/2). Two-constant Cody-Waite reduction of (x + phase) to [-pi, pi]:
    # k = round((x + phase) / (2*pi)), r = (x + phase) - k*2*pi, computed with small
    # intermediate magnitudes so the reduced argument stays accurate (~1e-6) up to max_len.
    k = jnp.floor(x * _INV_TWO_PI + kbias)
    r = (x - k * _TWO_PI_HI) - k * _TWO_PI_LO + phase

    # Odd Horner polynomial (VPU mul/add only).
    r2 = r * r
    p = _SIN_COEFFS[-1]
    for coef in reversed(_SIN_COEFFS[:-1]):
        p = p * r2 + coef
    out_ref[...] = r * p


def positional_embedding_pallas(x, d_model=D_MODEL, max_len=MAX_LEN):
    """Equivalent of PositionalEmbedding(d_model, max_len).forward(x) -> (1, L, d_model)."""
    if d_model % 2 != 0:
        raise ValueError("d_model must be even (as in the PyTorch module)")
    if _LANES % d_model != 0:
        # TODO(synk): general d_model (not a divisor of 128) needs a non-folded layout.
        raise NotImplementedError("lane-dense fold requires d_model to divide 128")
    L = x.shape[1]
    if not 1 <= L <= max_len:
        raise ValueError("sequence length must be in [1, max_len]")

    fold = _LANES // d_model                     # positions packed per 128-lane row (4 for D=32)
    rows = pl.cdiv(L, fold)                      # rows of the lane-dense table
    tr = min(256, _round_up(rows, 8))            # rows per grid step (<= 1024 positions / step)
    rows_pad = _round_up(rows, tr)
    grid = (rows_pad // tr,)

    # Per-lane constants: computed once in the wrapper (so omega matches the reference's
    # jnp.exp bit-for-bit), 4 KiB, resident across all grid steps.
    lane = jnp.arange(_LANES, dtype=jnp.int32)
    col = lane % d_model
    parity = (col % 2).astype(jnp.float32)
    div_term = jnp.exp(
        jnp.arange(0, d_model, 2, dtype=jnp.float32) * (-math.log(10000.0) / d_model))
    consts = jnp.zeros((8, _LANES), jnp.float32)
    consts = consts.at[0].set(div_term[col // 2])                        # omega
    consts = consts.at[1].set((lane // d_model).astype(jnp.float32))     # off
    consts = consts.at[2].set(parity * (math.pi / 2.0))                  # phase
    consts = consts.at[3].set(0.5 + 0.25 * parity)                       # kbias

    table = pl.pallas_call(
        functools.partial(_pe_kernel, fold=fold),
        out_shape=jax.ShapeDtypeStruct((rows_pad, _LANES), jnp.float32),
        grid=grid,
        in_specs=[pl.BlockSpec((8, _LANES), lambda i: (0, 0))],
        out_specs=pl.BlockSpec((tr, _LANES), lambda i: (i, 0)),
        compiler_params=pltpu.CompilerParams(dimension_semantics=("parallel",)),
    )(consts)

    # Contiguous row-major unfold back to (1, L, d_model); padded rows are sliced off.
    return table.reshape(rows_pad * fold, d_model)[:L][None]


def positional_embedding_ref(x, d_model=D_MODEL, max_len=MAX_LEN):
    """Pure-JAX reference mirroring the PyTorch buffer construction + forward slice."""
    L = x.shape[1]
    position = jnp.arange(max_len, dtype=jnp.float32)[:, None]
    div_term = jnp.exp(
        jnp.arange(0, d_model, 2, dtype=jnp.float32) * (-math.log(10000.0) / d_model))
    pe = jnp.zeros((max_len, d_model), jnp.float32)
    pe = pe.at[:, 0::2].set(jnp.sin(position * div_term))
    pe = pe.at[:, 1::2].set(jnp.cos(position * div_term))
    return pe[None, :L, :]


if __name__ == "__main__":
    key = jax.random.PRNGKey(0)
    B, L = 2, 8
    # x's values are irrelevant to the module (only x.size(1) is used), as in PyTorch.
    x = jax.random.normal(key, (B, L, D_MODEL), jnp.float32)

    out = jax.block_until_ready(positional_embedding_pallas(x))
    ref = positional_embedding_ref(x)
    assert out.shape == (1, L, D_MODEL)
    if not jnp.allclose(out, ref, atol=1e-4, rtol=1e-4):
        raise AssertionError("Pallas kernel does not match reference (small L)")

    # Secondary check near max_len: exercises the multi-step parallel grid, the padding
    # slice-off, and the Cody-Waite range reduction at large positions.
    L2 = 4999
    x2 = jnp.zeros((1, L2, D_MODEL), jnp.float32)
    out2 = jax.block_until_ready(positional_embedding_pallas(x2))
    ref2 = positional_embedding_ref(x2)
    if not jnp.allclose(out2, ref2, atol=1e-4, rtol=1e-4):
        raise AssertionError("Pallas kernel does not match reference (large L)")

    print("KERNEL_OK")
</pallas_src>

<mosaic_0001>
module attributes {stable_mosaic.version = 11 : i64} {
  func.func @_pe_kernel(%arg0: i32, %arg1: memref<8x128xf32, #tpu.memory_space<vmem>>, %arg2: memref<8x128xf32, #tpu.memory_space<vmem>>) attributes {dimension_semantics = [#tpu.dimension_semantics<parallel>], iteration_bounds = array<i64: 1>, scalar_prefetch = 0 : i64, scratch_operands = 0 : i64, tpu.core_type = #tpu.core_type<tc>, window_params = [{pipeline_mode = #tpu.pipeline_mode<synchronous>, transform_indices = @transform_0, window_bounds = array<i64: 8, 128>}, {transform_indices = @transform_1, window_bounds = array<i64: 8, 128>}]} {
    %c0 = arith.constant 0 : index
    %c0_0 = arith.constant 0 : index
    %0 = vector.load %arg1[%c0, %c0_0] : memref<8x128xf32, #tpu.memory_space<vmem>>, vector<8x128xf32>
    %1 = vector.extract_strided_slice %0 {offsets = [0, 0], sizes = [1, 128], strides = [1, 1]} : vector<8x128xf32> to vector<1x128xf32>
    %2 = vector.extract_strided_slice %0 {offsets = [1, 0], sizes = [1, 128], strides = [1, 1]} : vector<8x128xf32> to vector<1x128xf32>
    %3 = vector.extract_strided_slice %0 {offsets = [2, 0], sizes = [1, 128], strides = [1, 1]} : vector<8x128xf32> to vector<1x128xf32>
    %4 = vector.extract_strided_slice %0 {offsets = [3, 0], sizes = [1, 128], strides = [1, 1]} : vector<8x128xf32> to vector<1x128xf32>
    %5 = tpu.iota {dimensions = array<i32: 0>} : vector<8x128xi32>
    %c32_i32 = arith.constant 32 : i32
    %6 = arith.muli %arg0, %c32_i32 : i32
    %c4_i32 = arith.constant 4 : i32
    %7 = vector.broadcast %c4_i32 : i32 to vector<8x128xi32>
    %8 = arith.muli %5, %7 : vector<8x128xi32>
    %9 = vector.broadcast %6 : i32 to vector<8x128xi32>
    %10 = arith.addi %8, %9 : vector<8x128xi32>
    %11 = arith.sitofp %10 : vector<8x128xi32> to vector<8x128xf32>
    %12 = vector.broadcast %2 : vector<1x128xf32> to vector<8x128xf32>
    %13 = arith.addf %11, %12 : vector<8x128xf32>
    %14 = vector.broadcast %1 : vector<1x128xf32> to vector<8x128xf32>
    %15 = arith.mulf %13, %14 : vector<8x128xf32>
    %cst = arith.constant 0.159154937 : f32
    %16 = vector.broadcast %cst : f32 to vector<8x128xf32>
    %17 = arith.mulf %15, %16 : vector<8x128xf32>
    %18 = vector.broadcast %4 : vector<1x128xf32> to vector<8x128xf32>
    %19 = arith.addf %17, %18 : vector<8x128xf32>
    %20 = math.floor %19 : vector<8x128xf32>
    %cst_1 = arith.constant 6.281250e+00 : f32
    %21 = vector.broadcast %cst_1 : f32 to vector<8x128xf32>
    %22 = arith.mulf %20, %21 : vector<8x128xf32>
    %23 = arith.subf %15, %22 : vector<8x128xf32>
    %cst_2 = arith.constant 0.00193530717 : f32
    %24 = vector.broadcast %cst_2 : f32 to vector<8x128xf32>
    %25 = arith.mulf %20, %24 : vector<8x128xf32>
    %26 = arith.subf %23, %25 : vector<8x128xf32>
    %27 = vector.broadcast %3 : vector<1x128xf32> to vector<8x128xf32>
    %28 = arith.addf %26, %27 : vector<8x128xf32>
    %29 = arith.mulf %28, %28 : vector<8x128xf32>
    %cst_3 = arith.constant 1.60590444E-10 : f32
    %30 = vector.broadcast %cst_3 : f32 to vector<8x128xf32>
    %31 = arith.mulf %30, %29 : vector<8x128xf32>
    %cst_4 = arith.constant -2.50521079E-8 : f32
    %32 = vector.broadcast %cst_4 : f32 to vector<8x128xf32>
    %33 = arith.addf %31, %32 : vector<8x128xf32>
    %34 = arith.mulf %33, %29 : vector<8x128xf32>
    %cst_5 = arith.constant 2.75573188E-6 : f32
    %35 = vector.broadcast %cst_5 : f32 to vector<8x128xf32>
    %36 = arith.addf %34, %35 : vector<8x128xf32>
    %37 = arith.mulf %36, %29 : vector<8x128xf32>
    %cst_6 = arith.constant -1.98412701E-4 : f32
    %38 = vector.broadcast %cst_6 : f32 to vector<8x128xf32>
    %39 = arith.addf %37, %38 : vector<8x128xf32>
    %40 = arith.mulf %39, %29 : vector<8x128xf32>
    %cst_7 = arith.constant 0.00833333377 : f32
    %41 = vector.broadcast %cst_7 : f32 to vector<8x128xf32>
    %42 = arith.addf %40, %41 : vector<8x128xf32>
    %43 = arith.mulf %42, %29 : vector<8x128xf32>
    %cst_8 = arith.constant -0.166666672 : f32
    %44 = vector.broadcast %cst_8 : f32 to vector<8x128xf32>
    %45 = arith.addf %43, %44 : vector<8x128xf32>
    %46 = arith.mulf %45, %29 : vector<8x128xf32>
    %cst_9 = arith.constant 1.000000e+00 : f32
    %47 = vector.broadcast %cst_9 : f32 to vector<8x128xf32>
    %48 = arith.addf %46, %47 : vector<8x128xf32>
    %49 = arith.mulf %28, %48 : vector<8x128xf32>
    %c0_10 = arith.constant 0 : index
    %c0_11 = arith.constant 0 : index
    %50 = vector.load %arg2[%c0_10, %c0_11] : memref<8x128xf32, #tpu.memory_space<vmem>>, vector<8x128xf32>
    tpu.vector_store %arg2[%c0_10, %c0_11], %49 {strides = array<i32>} : memref<8x128xf32, #tpu.memory_space<vmem>>, vector<8x128xf32>,
    return
  }
  func.func @transform_0(%arg0: i32) -> (i32, i32) {
    %c0_i32 = arith.constant 0 : i32
    %c0_i32_0 = arith.constant 0 : i32
    %c0_i32_1 = arith.constant 0 : i32
    return %c0_i32, %c0_i32_0 : i32, i32
  }
  func.func @transform_1(%arg0: i32) -> (i32, i32) {
    %c0_i32 = arith.constant 0 : i32
    %c0_i32_0 = arith.constant 0 : i32
    return %arg0, %c0_i32 : i32, i32
  }
}

</mosaic_0001>

<bundles_post_ra>
// kernel: tpu_custom_call.1
= control target key start
LH: loop header
LB: loop body
LE: loop exit
PB: predicated region body
PF: predicated region fallthrough
CT: control target
= control target key end

     0   :  { %6 = vsyncpa [#allocation3], 0  ;;  %s149_s0 = inlined_call_operand.hbm [shape: f32[8,128], index: 0, kind: input, shape index: {}]   ;;  %s150_s1 = inlined_call_operand.hbm [shape: f32[8,128], index: 1, kind: output, shape index: {}]  }
   0x1   :  { %7 = vsyncpa [#allocation4], 0  ;;  %s131_s6 = smov [#allocation2]  }
   0x2   :  { %s14_s7 = sshll.u32 %s131_s6, 4  ;;  %s15_s7 = int_to_ptr.vmem [resolvable:$true] %s14_s7 }
   0x3   :  { %s95_s8 = scalar_lea.vmem %s15_s7, 128  ;;  %p100_p1 = scmp.lt.s32.totalorder %s15_s7, %s15_s7 }
   0x4   :  { %p96_p0 = scmp.ne.s32.totalorder %s15_s7, %s95_s8  ;;  %p101_p2 = scmp.lt.s32.totalorder %s95_s8, %s95_s8 }
   0x6   :  { %p102_p3 = por %p101_p2, %p100_p1 }
   0x8   :  { %p103_p4 = pnand %p102_p3, %p96_p0 }
   0xa   :  { %106 = shalt.err (!%p103_p4)
}
   0xb   :  { %17 = dma.hbm_to_vmem [thread:$0]  %s149_s0, 128, %s15_s7, [#allocation3]  }
   0xc   :  { %127 = dma.done.wait [#allocation3], 128  }
   0xd   :  { %128 = vsyncadd [#allocation3], 4294967168  ;;  %v22_v0 = vlaneseq  ;;  %v21_v6 = vld [vmem:[#allocation2] sm:$0xff]  ;;  %s132_s0 = smov [#allocation5]  }
   0xe   :  { %s76_s11 = sshll.u32 %s132_s0, 4  ;;  %s77_s11 = int_to_ptr.vmem [resolvable:$true] %s76_s11 }
   0xf   :  { %v23_v1 = vshrl.u32 %v22_v0, 7  ;;  %s107_s12 = scalar_lea.vmem %s77_s11, 128  ;;  %p112_p6 = scmp.lt.s32.totalorder %s77_s11, %s77_s11 }
  0x10   :  { %p108_p5 = scmp.ne.s32.totalorder %s77_s11, %s107_s12  ;;  %p113_p7 = scmp.lt.s32.totalorder %s107_s12, %s107_s12 }
  0x11   :  { %v25_v2 = vmul.u32 4, %v23_v1  ;;  %v31_v3 = vsub.s32 1, %v23_v1  ;;  %v36_v4 = vsub.s32 0, %v23_v1  ;;  %v42_v9 = vsub.s32 3, %v23_v1 }
  0x12   :  { %v52_v16 = vsub.s32 2, %v23_v1  ;;  %p114_p8 = por %p113_p7, %p112_p6 }
  0x13   :  { %v28_v5 = vcvt.s32.f32 %v25_v2  ;;  %v32_v7 = vrot.slane %v21_v6, %v31_v3  ;;  %v37_v8 = vrot.slane %v21_v6, %v36_v4  ;;  %v43_v12 = vrot.slane %v21_v6, %v42_v9 }
  0x14   :  { %v53_v20 = vrot.slane %v21_v6, %v52_v16  ;;  %p115_p9 = pnand %p114_p8, %p108_p5 }
  0x15   :  { %v33_v10 = vadd.f32 %v32_v7, %v28_v5 }
  0x17   :  { %v38_v11 = vmul.f32 %v37_v8, %v33_v10 }
  0x19   :  { %v39_v13 = vmul.f32 0.15915494, %v38_v11 }
  0x1b   :  { %v44_v14 = vadd.f32 %v43_v12, %v39_v13 }
  0x1d   :  { %v45_v15 = vfloor.f32 %v44_v14 }
  0x1f   :  { %v46_v17 = vmul.f32 6.28125, %v45_v15  ;;  %v48_v18 = vmul.f32 0.0019353072, %v45_v15 }
  0x21   :  { %v47_v19 = vsub.f32 %v38_v11, %v46_v17 }
  0x23   :  { %v49_v21 = vsub.f32 %v47_v19, %v48_v18 }
  0x25   :  { %v54_v22 = vadd.f32 %v53_v20, %v49_v21 }
  0x27   :  { %v55_v23 = vmul.f32 %v54_v22, %v54_v22 }
  0x29   :  { %v56_v24 = vmul.f32 1.6059044e-10, %v55_v23 }
  0x2b   :  { %v57_v25 = vadd.f32 -2.5052108e-08, %v56_v24 }
  0x2d   :  { %v58_v26 = vmul.f32 %v57_v25, %v55_v23 }
  0x2f   :  { %v59_v27 = vadd.f32 2.7557319e-06, %v58_v26 }
  0x31   :  { %v60_v28 = vmul.f32 %v59_v27, %v55_v23 }
  0x33   :  { %v61_v29 = vadd.f32 -0.0001984127, %v60_v28 }
  0x35   :  { %v62_v30 = vmul.f32 %v61_v29, %v55_v23 }
  0x37   :  { %v63_v31 = vadd.f32 0.008333334, %v62_v30 }
  0x39   :  { %v64_v32 = vmul.f32 %v63_v31, %v55_v23 }
  0x3b   :  { %v65_v33 = vadd.f32 -0.16666667, %v64_v32 }
  0x3d   :  { %v66_v34 = vmul.f32 %v65_v33, %v55_v23 }
  0x3f   :  { %v67_v35 = vadd.f32 1.0, %v66_v34 }
  0x41   :  { %v68_v36 = vmul.f32 %v67_v35, %v54_v22 }
  0x43   :  { %69 = vst [vmem:[#allocation5] sm:$0xff] %v68_v36 }
  0x44   :  { %118 = shalt.err (!%p115_p9)
}
  0x45   :  { %79 = dma.vmem_to_hbm [thread:$0]  %s77_s11, 128, %s150_s1, [#allocation4]  }
  0x46   :  { %129 = dma.done.wait [#allocation4], 128  }
  0x47   :  { %130 = vsyncadd [#allocation4], 4294967168 }
  0x48   :  { %83 = vsyncpa [#allocation3], 1 }
  0x49   :  { %84 = vsyncpa [#allocation4], 1 }

</bundles_post_ra>
